<compile_context>
chip_gen: v5e
topology: v5e:2x2
jax: 0.10.0
libtpu: 0.0.40
codegen_flags: <defaults>
</compile_context>

<pallas_src>
import functools
import math

import jax
import jax.numpy as jnp
from jax.experimental import pallas as pl
from jax.experimental.pallas import tpu as pltpu

_LANE = 128     # last-dim vreg width
_SUBLANE = 8    # f32 sublane count


def _round_up(n: int, m: int) -> int:
    return ((n + m - 1) // m) * m


def _mlp_kernel(x_ref, *refs, num_layers: int, relu_flags):
    """Fused y = ReLU(... ReLU(x@W0+b0) ...)@W_last + b_last.

    refs = (w0, b0, w1, b1, ..., w_{L-1}, b_{L-1}, o_ref). Intermediates live
    in VMEM/vregs only; a single store writes the final (TB, Cout) tile.
    The matmul accumulates in f32 (preferred_element_type); the bias + ReLU
    epilogue stays on the f32 accumulator regardless of the weight dtype.
    """
    o_ref = refs[-1]
    h = x_ref[...]
    for l in range(num_layers):
        w = refs[2 * l][...]
        b = refs[2 * l + 1][...]          # bias kept in f32
        h = jnp.dot(h.astype(w.dtype), w,
                    preferred_element_type=jnp.float32) + b
        if relu_flags[l]:
            h = jnp.maximum(h, 0.0)
    o_ref[...] = h.astype(o_ref.dtype)


def prepare_mlp_params(params, *, compute_dtype=jnp.float32):
    """Pad weights/biases ONCE (call at init time, not per forward).

    params: list of (w (ci, cj), b (1, cj) or (cj,), relu_flag).
    Hidden widths are zero-padded to 128 lanes; the first layer's input dim
    and the last layer's output dim are left unpadded. Padded weight columns
    and bias lanes are zero, so padded hidden lanes stay exactly zero through
    ReLU and the math is unchanged. Biases stay f32 (epilogue is f32).
    """
    n = len(params)
    padded = []
    for l, (w, b, relu) in enumerate(params):
        ci, co = w.shape
        pci = ci if l == 0 else _round_up(ci, _LANE)
        pco = co if l == n - 1 else _round_up(co, _LANE)
        wp = jnp.zeros((pci, pco), compute_dtype).at[:ci, :co].set(
            w.astype(compute_dtype))
        bp = jnp.zeros((1, pco), jnp.float32).at[:, :co].set(
            jnp.reshape(b, (1, co)).astype(jnp.float32))
        padded.append((wp, bp, bool(relu)))
    return padded


def mlp_forward(x, padded_params, *, batch_tile: int = 512):
    """x: (B, Cin); padded_params: output of prepare_mlp_params."""
    B, Cin = x.shape
    assert Cin == padded_params[0][0].shape[0]
    Cout = padded_params[-1][0].shape[1]
    num_layers = len(padded_params)
    relu_flags = tuple(r for (_, _, r) in padded_params)

    # Batch tile: multiple of 8 sublanes; prefer >= 2 grid steps for megacore.
    TB = min(batch_tile, _round_up(B, _SUBLANE))
    if B >= 2 * _SUBLANE:
        TB = min(TB, _round_up(pl.cdiv(B, 2), _SUBLANE))
    TB = _round_up(TB, _SUBLANE)
    PB = _round_up(B, TB)

    # Row-only pad (no lane inflation) when B is not a multiple of the tile.
    x_in = x if PB == B else jnp.zeros((PB, Cin), x.dtype).at[:B].set(x)

    kernel = functools.partial(_mlp_kernel, num_layers=num_layers,
                               relu_flags=relu_flags)

    inputs = [x_in]
    wb_shapes = []
    for wp, bp, _ in padded_params:
        inputs.extend([wp, bp])
        wb_shapes.extend([wp.shape, bp.shape])

    x_spec = pl.BlockSpec((TB, Cin), lambda i: (i, 0))
    out_spec = pl.BlockSpec((TB, Cout), lambda i: (i, 0))
    out_shape = jax.ShapeDtypeStruct((PB, Cout), x.dtype)

    out_itemsize = jnp.dtype(x.dtype).itemsize
    w_bytes = sum(int(w.size) * w.dtype.itemsize + int(b.size) * b.dtype.itemsize
                  for w, b, _ in padded_params)
    max_width = max([Cin] + [w.shape[1] for w, _, _ in padded_params])
    flops = 2 * PB * sum(w.shape[0] * w.shape[1] for w, _, _ in padded_params)
    bytes_accessed = (int(x_in.size) * x_in.dtype.itemsize + w_bytes
                      + PB * Cout * out_itemsize)
    cost = pl.CostEstimate(flops=flops, transcendentals=0,
                           bytes_accessed=bytes_accessed)

    def build(weight_buffer_count):
        in_specs = [x_spec]
        for shape in wb_shapes:
            if weight_buffer_count is None:
                in_specs.append(pl.BlockSpec(shape, lambda i: (0, 0)))
            else:
                in_specs.append(pl.BlockSpec(
                    shape, lambda i: (0, 0),
                    pipeline_mode=pl.Buffered(weight_buffer_count)))
        wbuf = 2 if weight_buffer_count is None else weight_buffer_count
        # VMEM budget: resident weights + double-buffered x/out tiles + the
        # live f32 activation chain, plus headroom; clamped for v5e..v7x.
        vmem_needed = (wbuf * w_bytes
                       + 2 * TB * Cin * x_in.dtype.itemsize
                       + 2 * TB * Cout * out_itemsize
                       + 4 * TB * max_width * 4)
        vmem_limit = int(min(max(2 * vmem_needed + (4 << 20), 16 << 20),
                             48 << 20))
        return pl.pallas_call(
            kernel,
            out_shape=out_shape,
            grid=(PB // TB,),
            in_specs=in_specs,
            out_specs=out_spec,
            compiler_params=pltpu.CompilerParams(
                dimension_semantics=("parallel",),
                vmem_limit_bytes=vmem_limit),
            cost_estimate=cost,
        )

    try:
        # Single-buffer the VMEM-resident weights (constant index_map).
        out = build(1)(*inputs)
    except Exception:
        # Fall back to default double-buffered weight specs if Buffered(1)
        # is not accepted by this Pallas/Mosaic version.
        out = build(None)(*inputs)

    return out if PB == B else out[:B]


def init_mlp_params(key, in_features: int, out_features: int, channel_mults):
    """Deterministic init matching nn.Linear's U(-1/sqrt(fan_in), +1/sqrt(fan_in))."""
    channels = [in_features] + [int(in_features * m) for m in channel_mults]
    channel_pairs = list(zip(channels[:-1], channels[1:]))
    params = []
    # Hidden layers (Linear + ReLU) use all pairs except the last.
    for (ci, cj) in channel_pairs[:-1]:
        key, kw, kb = jax.random.split(key, 3)
        bound = 1.0 / math.sqrt(ci)
        w = jax.random.uniform(kw, (ci, cj), jnp.float32, -bound, bound)
        b = jax.random.uniform(kb, (1, cj), jnp.float32, -bound, bound)
        params.append((w, b, True))   # True -> apply ReLU
    # Final layer: Linear(channel_pairs[-1][0], out_features), no ReLU.
    ci = channel_pairs[-1][0]
    key, kw, kb = jax.random.split(key, 3)
    bound = 1.0 / math.sqrt(ci)
    w = jax.random.uniform(kw, (ci, out_features), jnp.float32, -bound, bound)
    b = jax.random.uniform(kb, (1, out_features), jnp.float32, -bound, bound)
    params.append((w, b, False))
    return params


if __name__ == "__main__":
    # Shapes consistent with the module's forward:
    #   MLP(in_features=16, out_features=8, channel_mults=[2, 4, 2])
    # -> channels [16, 32, 64, 32]; hidden: 16->32->64 (ReLU), final: 64->8
    in_features, out_features = 16, 8
    channel_mults = [2, 4, 2]
    batch = 8

    key = jax.random.PRNGKey(0)
    kx, kp = jax.random.split(key)
    x = jax.random.normal(kx, (batch, in_features), jnp.float32)
    params = init_mlp_params(kp, in_features, out_features, channel_mults)

    # Pure-JAX reference of the same math.
    ref = x
    for (w, b, relu) in params:
        ref = ref @ w + b
        if relu:
            ref = jnp.maximum(ref, 0.0)

    # f32 path: exact numerics.
    prepared_f32 = prepare_mlp_params(params, compute_dtype=jnp.float32)
    out = jax.block_until_ready(mlp_forward(x, prepared_f32))
    assert out.shape == (batch, out_features)
    assert jnp.allclose(out, ref, atol=1e-5, rtol=1e-5)

    # bf16-weight path (v6e/v7x MXU-friendly): f32 accumulation + f32 epilogue.
    prepared_bf16 = prepare_mlp_params(params, compute_dtype=jnp.bfloat16)
    out_bf16 = jax.block_until_ready(mlp_forward(x, prepared_bf16))
    assert out_bf16.shape == (batch, out_features)
    assert jnp.allclose(out_bf16, ref, atol=1e-1, rtol=5e-2)

    print("KERNEL_OK")
</pallas_src>

<mosaic_0001>
module attributes {stable_mosaic.version = 11 : i64} {
  func.func @_mlp_kernel(%arg0: i32, %arg1: memref<8x16xf32, #tpu.memory_space<vmem>>, %arg2: memref<16x128xf32, #tpu.memory_space<vmem>>, %arg3: memref<1x128xf32, #tpu.memory_space<vmem>>, %arg4: memref<128x128xf32, #tpu.memory_space<vmem>>, %arg5: memref<1x128xf32, #tpu.memory_space<vmem>>, %arg6: memref<128x8xf32, #tpu.memory_space<vmem>>, %arg7: memref<1x8xf32, #tpu.memory_space<vmem>>, %arg8: memref<8x8xf32, #tpu.memory_space<vmem>>) attributes {dimension_semantics = [#tpu.dimension_semantics<parallel>], iteration_bounds = array<i64: 1>, scalar_prefetch = 0 : i64, scratch_operands = 0 : i64, tpu.core_type = #tpu.core_type<tc>, window_params = [{transform_indices = @transform_0, window_bounds = array<i64: 8, 16>}, {pipeline_mode = #tpu.pipeline_mode<synchronous>, transform_indices = @transform_1, window_bounds = array<i64: 16, 128>}, {pipeline_mode = #tpu.pipeline_mode<synchronous>, transform_indices = @transform_2, window_bounds = array<i64: 1, 128>}, {pipeline_mode = #tpu.pipeline_mode<synchronous>, transform_indices = @transform_3, window_bounds = array<i64: 128, 128>}, {pipeline_mode = #tpu.pipeline_mode<synchronous>, transform_indices = @transform_4, window_bounds = array<i64: 1, 128>}, {pipeline_mode = #tpu.pipeline_mode<synchronous>, transform_indices = @transform_5, window_bounds = array<i64: 128, 8>}, {pipeline_mode = #tpu.pipeline_mode<synchronous>, transform_indices = @transform_6, window_bounds = array<i64: 1, 8>}, {transform_indices = @transform_7, window_bounds = array<i64: 8, 8>}]} {
    %c0 = arith.constant 0 : index
    %c0_0 = arith.constant 0 : index
    %0 = vector.load %arg1[%c0, %c0_0] : memref<8x16xf32, #tpu.memory_space<vmem>>, vector<8x16xf32>
    %c0_1 = arith.constant 0 : index
    %c0_2 = arith.constant 0 : index
    %1 = vector.load %arg2[%c0_1, %c0_2] : memref<16x128xf32, #tpu.memory_space<vmem>>, vector<16x128xf32>
    %c0_3 = arith.constant 0 : index
    %c0_4 = arith.constant 0 : index
    %2 = vector.load %arg3[%c0_3, %c0_4] : memref<1x128xf32, #tpu.memory_space<vmem>>, vector<1x128xf32>
    %cst = arith.constant dense<0.000000e+00> : vector<8x128xf32>
    %3 = tpu.matmul %0, %1, %cst {dimension_numbers = #tpu.dot_dimension_numbers<[1], [0], [0], [1], [0, 0, 1, 1], [], []>} : vector<8x16xf32>, vector<16x128xf32>, vector<8x128xf32> -> vector<8x128xf32>
    %4 = vector.broadcast %2 : vector<1x128xf32> to vector<8x128xf32>
    %5 = arith.addf %3, %4 : vector<8x128xf32>
    %cst_5 = arith.constant 0.000000e+00 : f32
    %6 = vector.broadcast %cst_5 : f32 to vector<8x128xf32>
    %7 = arith.maximumf %5, %6 : vector<8x128xf32>
    %c0_6 = arith.constant 0 : index
    %c0_7 = arith.constant 0 : index
    %8 = vector.load %arg4[%c0_6, %c0_7] : memref<128x128xf32, #tpu.memory_space<vmem>>, vector<128x128xf32>
    %c0_8 = arith.constant 0 : index
    %c0_9 = arith.constant 0 : index
    %9 = vector.load %arg5[%c0_8, %c0_9] : memref<1x128xf32, #tpu.memory_space<vmem>>, vector<1x128xf32>
    %cst_10 = arith.constant dense<0.000000e+00> : vector<8x128xf32>
    %10 = tpu.matmul %7, %8, %cst_10 {dimension_numbers = #tpu.dot_dimension_numbers<[1], [0], [0], [1], [0, 0, 1, 1], [], []>} : vector<8x128xf32>, vector<128x128xf32>, vector<8x128xf32> -> vector<8x128xf32>
    %11 = vector.broadcast %9 : vector<1x128xf32> to vector<8x128xf32>
    %12 = arith.addf %10, %11 : vector<8x128xf32>
    %cst_11 = arith.constant 0.000000e+00 : f32
    %13 = vector.broadcast %cst_11 : f32 to vector<8x128xf32>
    %14 = arith.maximumf %12, %13 : vector<8x128xf32>
    %c0_12 = arith.constant 0 : index
    %c0_13 = arith.constant 0 : index
    %15 = vector.load %arg6[%c0_12, %c0_13] : memref<128x8xf32, #tpu.memory_space<vmem>>, vector<128x8xf32>
    %c0_14 = arith.constant 0 : index
    %c0_15 = arith.constant 0 : index
    %16 = vector.load %arg7[%c0_14, %c0_15] : memref<1x8xf32, #tpu.memory_space<vmem>>, vector<1x8xf32>
    %cst_16 = arith.constant dense<0.000000e+00> : vector<8x8xf32>
    %17 = tpu.matmul %14, %15, %cst_16 {dimension_numbers = #tpu.dot_dimension_numbers<[1], [0], [0], [1], [0, 0, 1, 1], [], []>} : vector<8x128xf32>, vector<128x8xf32>, vector<8x8xf32> -> vector<8x8xf32>
    %18 = vector.broadcast %16 : vector<1x8xf32> to vector<8x8xf32>
    %19 = arith.addf %17, %18 : vector<8x8xf32>
    %c0_17 = arith.constant 0 : index
    %c0_18 = arith.constant 0 : index
    %20 = vector.load %arg8[%c0_17, %c0_18] : memref<8x8xf32, #tpu.memory_space<vmem>>, vector<8x8xf32>
    tpu.vector_store %arg8[%c0_17, %c0_18], %19 {strides = array<i32>} : memref<8x8xf32, #tpu.memory_space<vmem>>, vector<8x8xf32>,
    return
  }
  func.func @transform_0(%arg0: i32) -> (i32, i32) {
    %c0_i32 = arith.constant 0 : i32
    %c0_i32_0 = arith.constant 0 : i32
    return %arg0, %c0_i32 : i32, i32
  }
  func.func @transform_1(%arg0: i32) -> (i32, i32) {
    %c0_i32 = arith.constant 0 : i32
    %c0_i32_0 = arith.constant 0 : i32
    %c0_i32_1 = arith.constant 0 : i32
    return %c0_i32, %c0_i32_0 : i32, i32
  }
  func.func @transform_2(%arg0: i32) -> (i32, i32) {
    %c0_i32 = arith.constant 0 : i32
    %c0_i32_0 = arith.constant 0 : i32
    %c0_i32_1 = arith.constant 0 : i32
    return %c0_i32, %c0_i32_0 : i32, i32
  }
  func.func @transform_3(%arg0: i32) -> (i32, i32) {
    %c0_i32 = arith.constant 0 : i32
    %c0_i32_0 = arith.constant 0 : i32
    %c0_i32_1 = arith.constant 0 : i32
    return %c0_i32, %c0_i32_0 : i32, i32
  }
  func.func @transform_4(%arg0: i32) -> (i32, i32) {
    %c0_i32 = arith.constant 0 : i32
    %c0_i32_0 = arith.constant 0 : i32
    %c0_i32_1 = arith.constant 0 : i32
    return %c0_i32, %c0_i32_0 : i32, i32
  }
  func.func @transform_5(%arg0: i32) -> (i32, i32) {
    %c0_i32 = arith.constant 0 : i32
    %c0_i32_0 = arith.constant 0 : i32
    %c0_i32_1 = arith.constant 0 : i32
    return %c0_i32, %c0_i32_0 : i32, i32
  }
  func.func @transform_6(%arg0: i32) -> (i32, i32) {
    %c0_i32 = arith.constant 0 : i32
    %c0_i32_0 = arith.constant 0 : i32
    %c0_i32_1 = arith.constant 0 : i32
    return %c0_i32, %c0_i32_0 : i32, i32
  }
  func.func @transform_7(%arg0: i32) -> (i32, i32) {
    %c0_i32 = arith.constant 0 : i32
    %c0_i32_0 = arith.constant 0 : i32
    return %arg0, %c0_i32 : i32, i32
  }
}

module attributes {stable_mosaic.version = 11 : i64} {
  func.func @_mlp_kernel(%arg0: i32, %arg1: memref<8x16xf32, #tpu.memory_space<vmem>>, %arg2: memref<16x128xf32, #tpu.memory_space<vmem>>, %arg3: memref<1x128xf32, #tpu.memory_space<vmem>>, %arg4: memref<128x128xf32, #tpu.memory_space<vmem>>, %arg5: memref<1x128xf32, #tpu.memory_space<vmem>>, %arg6: memref<128x8xf32, #tpu.memory_space<vmem>>, %arg7: memref<1x8xf32, #tpu.memory_space<vmem>>, %arg8: memref<8x8xf32, #tpu.memory_space<vmem>>) attributes {dimension_semantics = [#tpu.dimension_semantics<parallel>], iteration_bounds = array<i64: 1>, scalar_prefetch = 0 : i64, scratch_operands = 0 : i64, tpu.core_type = #tpu.core_type<tc>, window_params = [{transform_indices = @transform_0, window_bounds = array<i64: 8, 16>}, {pipeline_mode = #tpu.pipeline_mode<synchronous>, transform_indices = @transform_1, window_bounds = array<i64: 16, 128>}, {pipeline_mode = #tpu.pipeline_mode<synchronous>, transform_indices = @transform_2, window_bounds = array<i64: 1, 128>}, {pipeline_mode = #tpu.pipeline_mode<synchronous>, transform_indices = @transform_3, window_bounds = array<i64: 128, 128>}, {pipeline_mode = #tpu.pipeline_mode<synchronous>, transform_indices = @transform_4, window_bounds = array<i64: 1, 128>}, {pipeline_mode = #tpu.pipeline_mode<synchronous>, transform_indices = @transform_5, window_bounds = array<i64: 128, 8>}, {pipeline_mode = #tpu.pipeline_mode<synchronous>, transform_indices = @transform_6, window_bounds = array<i64: 1, 8>}, {transform_indices = @transform_7, window_bounds = array<i64: 8, 8>}]} {
    %c0 = arith.constant 0 : index
    %c0_0 = arith.constant 0 : index
    %0 = vector.load %arg1[%c0, %c0_0] : memref<8x16xf32, #tpu.memory_space<vmem>>, vector<8x16xf32>
    %c0_1 = arith.constant 0 : index
    %c0_2 = arith.constant 0 : index
    %1 = vector.load %arg2[%c0_1, %c0_2] : memref<16x128xf32, #tpu.memory_space<vmem>>, vector<16x128xf32>
    %c0_3 = arith.constant 0 : index
    %c0_4 = arith.constant 0 : index
    %2 = vector.load %arg3[%c0_3, %c0_4] : memref<1x128xf32, #tpu.memory_space<vmem>>, vector<1x128xf32>
    %cst = arith.constant dense<0.000000e+00> : vector<8x128xf32>
    %3 = tpu.matmul %0, %1, %cst {dimension_numbers = #tpu.dot_dimension_numbers<[1], [0], [0], [1], [0, 0, 1, 1], [], []>} : vector<8x16xf32>, vector<16x128xf32>, vector<8x128xf32> -> vector<8x128xf32>
    %4 = vector.broadcast %2 : vector<1x128xf32> to vector<8x128xf32>
    %5 = arith.addf %3, %4 : vector<8x128xf32>
    %cst_5 = arith.constant 0.000000e+00 : f32
    %6 = vector.broadcast %cst_5 : f32 to vector<8x128xf32>
    %7 = arith.maximumf %5, %6 : vector<8x128xf32>
    %c0_6 = arith.constant 0 : index
    %c0_7 = arith.constant 0 : index
    %8 = vector.load %arg4[%c0_6, %c0_7] : memref<128x128xf32, #tpu.memory_space<vmem>>, vector<128x128xf32>
    %c0_8 = arith.constant 0 : index
    %c0_9 = arith.constant 0 : index
    %9 = vector.load %arg5[%c0_8, %c0_9] : memref<1x128xf32, #tpu.memory_space<vmem>>, vector<1x128xf32>
    %cst_10 = arith.constant dense<0.000000e+00> : vector<8x128xf32>
    %10 = tpu.matmul %7, %8, %cst_10 {dimension_numbers = #tpu.dot_dimension_numbers<[1], [0], [0], [1], [0, 0, 1, 1], [], []>} : vector<8x128xf32>, vector<128x128xf32>, vector<8x128xf32> -> vector<8x128xf32>
    %11 = vector.broadcast %9 : vector<1x128xf32> to vector<8x128xf32>
    %12 = arith.addf %10, %11 : vector<8x128xf32>
    %cst_11 = arith.constant 0.000000e+00 : f32
    %13 = vector.broadcast %cst_11 : f32 to vector<8x128xf32>
    %14 = arith.maximumf %12, %13 : vector<8x128xf32>
    %c0_12 = arith.constant 0 : index
    %c0_13 = arith.constant 0 : index
    %15 = vector.load %arg6[%c0_12, %c0_13] : memref<128x8xf32, #tpu.memory_space<vmem>>, vector<128x8xf32>
    %c0_14 = arith.constant 0 : index
    %c0_15 = arith.constant 0 : index
    %16 = vector.load %arg7[%c0_14, %c0_15] : memref<1x8xf32, #tpu.memory_space<vmem>>, vector<1x8xf32>
    %cst_16 = arith.constant dense<0.000000e+00> : vector<8x8xf32>
    %17 = tpu.matmul %14, %15, %cst_16 {dimension_numbers = #tpu.dot_dimension_numbers<[1], [0], [0], [1], [0, 0, 1, 1], [], []>} : vector<8x128xf32>, vector<128x8xf32>, vector<8x8xf32> -> vector<8x8xf32>
    %18 = vector.broadcast %16 : vector<1x8xf32> to vector<8x8xf32>
    %19 = arith.addf %17, %18 : vector<8x8xf32>
    %c0_17 = arith.constant 0 : index
    %c0_18 = arith.constant 0 : index
    %20 = vector.load %arg8[%c0_17, %c0_18] : memref<8x8xf32, #tpu.memory_space<vmem>>, vector<8x8xf32>
    tpu.vector_store %arg8[%c0_17, %c0_18], %19 {strides = array<i32>} : memref<8x8xf32, #tpu.memory_space<vmem>>, vector<8x8xf32>,
    return
  }
  func.func @transform_0(%arg0: i32) -> (i32, i32) {
    %c0_i32 = arith.constant 0 : i32
    %c0_i32_0 = arith.constant 0 : i32
    return %arg0, %c0_i32 : i32, i32
  }
  func.func @transform_1(%arg0: i32) -> (i32, i32) {
    %c0_i32 = arith.constant 0 : i32
    %c0_i32_0 = arith.constant 0 : i32
    %c0_i32_1 = arith.constant 0 : i32
    return %c0_i32, %c0_i32_0 : i32, i32
  }
  func.func @transform_2(%arg0: i32) -> (i32, i32) {
    %c0_i32 = arith.constant 0 : i32
    %c0_i32_0 = arith.constant 0 : i32
    %c0_i32_1 = arith.constant 0 : i32
    return %c0_i32, %c0_i32_0 : i32, i32
  }
  func.func @transform_3(%arg0: i32) -> (i32, i32) {
    %c0_i32 = arith.constant 0 : i32
    %c0_i32_0 = arith.constant 0 : i32
    %c0_i32_1 = arith.constant 0 : i32
    return %c0_i32, %c0_i32_0 : i32, i32
  }
  func.func @transform_4(%arg0: i32) -> (i32, i32) {
    %c0_i32 = arith.constant 0 : i32
    %c0_i32_0 = arith.constant 0 : i32
    %c0_i32_1 = arith.constant 0 : i32
    return %c0_i32, %c0_i32_0 : i32, i32
  }
  func.func @transform_5(%arg0: i32) -> (i32, i32) {
    %c0_i32 = arith.constant 0 : i32
    %c0_i32_0 = arith.constant 0 : i32
    %c0_i32_1 = arith.constant 0 : i32
    return %c0_i32, %c0_i32_0 : i32, i32
  }
  func.func @transform_6(%arg0: i32) -> (i32, i32) {
    %c0_i32 = arith.constant 0 : i32
    %c0_i32_0 = arith.constant 0 : i32
    %c0_i32_1 = arith.constant 0 : i32
    return %c0_i32, %c0_i32_0 : i32, i32
  }
  func.func @transform_7(%arg0: i32) -> (i32, i32) {
    %c0_i32 = arith.constant 0 : i32
    %c0_i32_0 = arith.constant 0 : i32
    return %arg0, %c0_i32 : i32, i32
  }
}

</mosaic_0001>

<bundles_post_ra>
// kernel: tpu_custom_call.1
= control target key start
LH: loop header
LB: loop body
LE: loop exit
PB: predicated region body
PF: predicated region fallthrough
CT: control target
= control target key end

     0   :  { %12 = vsyncpa [#allocation3], 0  ;;  %s393_s0 = inlined_call_operand.vmem [shape: f32[8,16], index: 0, kind: input, shape index: {}]   ;;  %s394_s1 = inlined_call_operand.hbm [shape: f32[16,128], index: 1, kind: input, shape index: {}]   ;;  %s395_s2 = inlined_call_operand.vmem [shape: f32[1,128], index: 2, kind: input, shape index: {}]   ;;  %s396_s3 = inlined_call_operand.vmem [shape: f32[128,128], index: 3, kind: input, shape index: {}]   ;;  %s397_s4 = inlined_call_operand.vmem [shape: f32[1,128], index: 4, kind: input, shape index: {}]   ;;  %s398_s5 = inlined_call_operand.vmem [shape: f32[128,8], index: 5, kind: input, shape index: {}]   ;;  %s399_s6 = inlined_call_operand.vmem [shape: f32[1,8], index: 6, kind: input, shape index: {}]   ;;  %s400_s7 = inlined_call_operand.hbm [shape: f32[8,8], index: 7, kind: output, shape index: {}]  }
   0x1   :  { %13 = vsyncpa [#allocation4], 0  ;;  %s20_s26 = sshll.u32 %s394_s1, 4  ;;  %s235_s27 = smov [#allocation2]   ;;  %s21_s26 = int_to_ptr.hbm [resolvable:$true] %s20_s26 }
   0x2   :  { %s22_s28 = sshll.u32 %s235_s27, 4  ;;  %s236_s29 = smov 128   ;;  %s23_s28 = int_to_ptr.vmem [resolvable:$true] %s22_s28 }
   0x3   :  { %s237_s30 = smov 8  }
   0x4   :  { %28 = dma.hbm_to_vmem [thread:$0]  %s21_s26, 256, %s23_s28, [#allocation3], %s236_s29, %s236_s29, %s237_s30  }
   0x5   :  { %231 = dma.done.wait [#allocation3], 256  }
   0x6   :  { %232 = vsyncadd [#allocation3], 4294967040  ;;  %v45_v0 = vld [vmem:[#allocation2 + $0x8] sm:$0xff]  ;;  %v44_v1 = vld [vmem:[#allocation2] sm:$0xff]  ;;  %vm50_vm0 = vcmask 130048   ;;  %s238_s25 = smov [#allocation5]  }
   0x7   :  { %68 = vmatpush.msra.mxu0 %v45_v0  ;;  %v43_v2 = vld [vmem:[%s393_s0] sm:$0xff]  ;;  %v90_v3 = vld [vmem:[%s396_s3 + $0x78] sm:$0xff]  ;;  %v89_v4 = vld [vmem:[%s396_s3 + $0x70] sm:$0xff]  ;;  %s163_s26 = sshll.u32 %s238_s25, 4  ;;  %s165_s29 = sshll.u32 %s400_s7, 4  ;;  %vm156_vm1 = vcmask 64512   ;;  %s164_s26 = int_to_ptr.vmem [resolvable:$true] %s163_s26  ;;  %s166_s29 = int_to_ptr.hbm [resolvable:$true] %s165_s29 }
   0x8   :  { %95 = vmatpush.msra.mxu1 %v90_v3  ;;  %v88_v5 = vld [vmem:[%s396_s3 + $0x68] sm:$0xff]  ;;  %v87_v6 = vld [vmem:[%s396_s3 + $0x60] sm:$0xff]  ;;  %v86_v7 = vld [vmem:[%s396_s3 + $0x58] sm:$0xff] }
   0x9   :  { %69 = vmatpush.msra.mxu0 %v44_v1  ;;  %v85_v8 = vld [vmem:[%s396_s3 + $0x50] sm:$0xff]  ;;  %v84_v9 = vld [vmem:[%s396_s3 + $0x48] sm:$0xff]  ;;  %v83_v10 = vld [vmem:[%s396_s3 + $0x40] sm:$0xff] }
   0xa   :  { %175 = vmatmul.msk.f32.vlgmr.msra.gmra.mxu0 %vm50_vm0, %v43_v2  ;;  %96 = vmatpush.msra.mxu1 %v89_v4  ;;  %v82_v11 = vld [vmem:[%s396_s3 + $0x38] sm:$0xff]  ;;  %v81_v12 = vld [vmem:[%s396_s3 + $0x30] sm:$0xff]  ;;  %v80_v13 = vld [vmem:[%s396_s3 + $0x28] sm:$0xff] }
   0xb   :  { %v79_v14 = vld [vmem:[%s396_s3 + $0x20] sm:$0xff]  ;;  %v78_v15 = vld [vmem:[%s396_s3 + $0x18] sm:$0xff]  ;;  %v77_v16 = vld [vmem:[%s396_s3 + $0x10] sm:$0xff] }
   0xc   :  { %97 = vmatpush.msra.mxu1 %v88_v5  ;;  %v76_v17 = vld [vmem:[%s396_s3 + $0x8] sm:$0xff]  ;;  %v75_v18 = vld [vmem:[%s396_s3] sm:$0xff]  ;;  %v131_v19 = vld [vmem:[%s398_s5 + $0x78] sm:$0xff] }
   0xd   :  { %v130_v20 = vld [vmem:[%s398_s5 + $0x70] sm:$0xff]  ;;  %136 = vmatpush.msra.mxu2 %v131_v19  ;;  %v129_v21 = vld [vmem:[%s398_s5 + $0x68] sm:$0xff]  ;;  %v128_v22 = vld [vmem:[%s398_s5 + $0x60] sm:$0xff] }
   0xe   :  { %98 = vmatpush.msra.mxu1 %v87_v6  ;;  %v127_v23 = vld [vmem:[%s398_s5 + $0x58] sm:$0xff]  ;;  %v126_v24 = vld [vmem:[%s398_s5 + $0x50] sm:$0xff]  ;;  %v125_v25 = vld [vmem:[%s398_s5 + $0x48] sm:$0xff] }
   0xf   :  { %137 = vmatpush.msra.mxu2 %v130_v20  ;;  %v124_v26 = vld [vmem:[%s398_s5 + $0x40] sm:$0xff]  ;;  %v123_v27 = vld [vmem:[%s398_s5 + $0x38] sm:$0xff]  ;;  %v122_v28 = vld [vmem:[%s398_s5 + $0x30] sm:$0xff] }
  0x10   :  { %99 = vmatpush.msra.mxu1 %v86_v7  ;;  %v121_v29 = vld [vmem:[%s398_s5 + $0x28] sm:$0xff]  ;;  %v120_v30 = vld [vmem:[%s398_s5 + $0x20] sm:$0xff]  ;;  %v119_v31 = vld [vmem:[%s398_s5 + $0x18] sm:$0xff] }
  0x11   :  { %138 = vmatpush.msra.mxu2 %v129_v21  ;;  %v180_v32 = vld [vmem:[%s395_s2] ss:$0 sm:$0xff]  ;;  %v118_v36 = vld [vmem:[%s398_s5 + $0x10] sm:$0xff]  ;;  %v117_v37 = vld [vmem:[%s398_s5 + $0x8] sm:$0xff] }
  0x12   :  { %100 = vmatpush.msra.mxu1 %v85_v8  ;;  %v116_v38 = vld [vmem:[%s398_s5] sm:$0xff] }
  0x13   :  { %139 = vmatpush.msra.mxu2 %v128_v22  ;;  %v181_v39 = vld [vmem:[%s397_s4] ss:$0 sm:$0xff] }
  0x14   :  { %101 = vmatpush.msra.mxu1 %v84_v9  ;;  %v182_v43 = vld [vmem:[%s399_s6] ss:$0 sm:$0xff] }
  0x15   :  { %140 = vmatpush.msra.mxu2 %v127_v23 }
  0x16   :  { %102 = vmatpush.msra.mxu1 %v83_v10 }
  0x17   :  { %141 = vmatpush.msra.mxu2 %v126_v24 }
  0x18   :  { %103 = vmatpush.msra.mxu1 %v82_v11 }
  0x19   :  { %142 = vmatpush.msra.mxu2 %v125_v25 }
  0x1a   :  { %104 = vmatpush.msra.mxu1 %v81_v12 }
  0x1b   :  { %143 = vmatpush.msra.mxu2 %v124_v26 }
  0x1c   :  { %105 = vmatpush.msra.mxu1 %v80_v13 }
  0x1d   :  { %144 = vmatpush.msra.mxu2 %v123_v27 }
  0x1e   :  { %106 = vmatpush.msra.mxu1 %v79_v14 }
  0x1f   :  { %145 = vmatpush.msra.mxu2 %v122_v28 }
  0x20   :  { %107 = vmatpush.msra.mxu1 %v78_v15 }
  0x21   :  { %146 = vmatpush.msra.mxu2 %v121_v29 }
  0x22   :  { %108 = vmatpush.msra.mxu1 %v77_v16 }
  0x23   :  { %147 = vmatpush.msra.mxu2 %v120_v30 }
  0x24   :  { %109 = vmatpush.msra.mxu1 %v76_v17 }
  0x25   :  { %148 = vmatpush.msra.mxu2 %v119_v31 }
  0x26   :  { %110 = vmatpush.msra.mxu1 %v75_v18 }
  0x27   :  { %149 = vmatpush.msra.mxu2 %v118_v36 }
  0x29   :  { %150 = vmatpush.msra.mxu2 %v117_v37 }
  0x2b   :  { %151 = vmatpush.msra.mxu2 %v116_v38 }
  0x87   :  { %v71_v33 = vpop.f32.mrf.mxu0 }
  0x88   :  { %v72_v34 = vadd.f32 %v180_v32, %v71_v33 }
  0x8a   :  { %v74_v35 = vmax.f32 %v72_v34, 0.0 }
  0x8c   :  { %111 = vmatmul.f32.vlgmr.msra.gmra.mxu1 %v74_v35 }
 0x109   :  { %v112_v40 = vpop.f32.mrf.mxu1 }
 0x10a   :  { %v113_v41 = vadd.f32 %v181_v39, %v112_v40 }
 0x10c   :  { %v115_v42 = vmax.f32 %v113_v41, 0.0 }
 0x10e   :  { %152 = vmatmul.f32.vlgmr.msra.gmra.mxu2 %v115_v42 }
 0x191   :  { %v153_v44 = vpop.f32.mrf.mxu2 }
 0x192   :  { %v154_v45 = vadd.f32 %v182_v43, %v153_v44 }
 0x194   :  { %157 = vst.msk [vmem:[#allocation5] sm:$0xff] %vm156_vm1, %v154_v45 }
 0x195   :  { %168 = dma.vmem_to_hbm [thread:$0]  %s164_s26, 128, %s166_s29, [#allocation4]  }
 0x196   :  { %233 = dma.done.wait [#allocation4], 128  }
 0x197   :  { %234 = vsyncadd [#allocation4], 4294967168 }
 0x198   :  { %173 = vsyncpa [#allocation3], 1 }
 0x199   :  { %174 = vsyncpa [#allocation4], 1 }

// kernel: tpu_custom_call.1
= control target key start
LH: loop header
LB: loop body
LE: loop exit
PB: predicated region body
PF: predicated region fallthrough
CT: control target
= control target key end

     0   :  { %12 = vsyncpa [#allocation3], 0  ;;  %s393_s0 = inlined_call_operand.vmem [shape: f32[8,16], index: 0, kind: input, shape index: {}]   ;;  %s394_s1 = inlined_call_operand.hbm [shape: f32[16,128], index: 1, kind: input, shape index: {}]   ;;  %s395_s2 = inlined_call_operand.vmem [shape: f32[1,128], index: 2, kind: input, shape index: {}]   ;;  %s396_s3 = inlined_call_operand.vmem [shape: f32[128,128], index: 3, kind: input, shape index: {}]   ;;  %s397_s4 = inlined_call_operand.vmem [shape: f32[1,128], index: 4, kind: input, shape index: {}]   ;;  %s398_s5 = inlined_call_operand.vmem [shape: f32[128,8], index: 5, kind: input, shape index: {}]   ;;  %s399_s6 = inlined_call_operand.vmem [shape: f32[1,8], index: 6, kind: input, shape index: {}]   ;;  %s400_s7 = inlined_call_operand.hbm [shape: f32[8,8], index: 7, kind: output, shape index: {}]  }
   0x1   :  { %13 = vsyncpa [#allocation4], 0  ;;  %s20_s26 = sshll.u32 %s394_s1, 4  ;;  %s235_s27 = smov [#allocation2]   ;;  %s21_s26 = int_to_ptr.hbm [resolvable:$true] %s20_s26 }
   0x2   :  { %s22_s28 = sshll.u32 %s235_s27, 4  ;;  %s236_s29 = smov 128   ;;  %s23_s28 = int_to_ptr.vmem [resolvable:$true] %s22_s28 }
   0x3   :  { %s237_s30 = smov 8  }
   0x4   :  { %28 = dma.hbm_to_vmem [thread:$0]  %s21_s26, 256, %s23_s28, [#allocation3], %s236_s29, %s236_s29, %s237_s30  }
   0x5   :  { %231 = dma.done.wait [#allocation3], 256  }
   0x6   :  { %232 = vsyncadd [#allocation3], 4294967040  ;;  %v45_v0 = vld [vmem:[#allocation2 + $0x8] sm:$0xff]  ;;  %v44_v1 = vld [vmem:[#allocation2] sm:$0xff]  ;;  %vm50_vm0 = vcmask 130048   ;;  %s238_s25 = smov [#allocation5]  }
   0x7   :  { %68 = vmatpush.msra.mxu0 %v45_v0  ;;  %v43_v2 = vld [vmem:[%s393_s0] sm:$0xff]  ;;  %v90_v3 = vld [vmem:[%s396_s3 + $0x78] sm:$0xff]  ;;  %v89_v4 = vld [vmem:[%s396_s3 + $0x70] sm:$0xff]  ;;  %s163_s26 = sshll.u32 %s238_s25, 4  ;;  %s165_s29 = sshll.u32 %s400_s7, 4  ;;  %vm156_vm1 = vcmask 64512   ;;  %s164_s26 = int_to_ptr.vmem [resolvable:$true] %s163_s26  ;;  %s166_s29 = int_to_ptr.hbm [resolvable:$true] %s165_s29 }
   0x8   :  { %95 = vmatpush.msra.mxu1 %v90_v3  ;;  %v88_v5 = vld [vmem:[%s396_s3 + $0x68] sm:$0xff]  ;;  %v87_v6 = vld [vmem:[%s396_s3 + $0x60] sm:$0xff]  ;;  %v86_v7 = vld [vmem:[%s396_s3 + $0x58] sm:$0xff] }
   0x9   :  { %69 = vmatpush.msra.mxu0 %v44_v1  ;;  %v85_v8 = vld [vmem:[%s396_s3 + $0x50] sm:$0xff]  ;;  %v84_v9 = vld [vmem:[%s396_s3 + $0x48] sm:$0xff]  ;;  %v83_v10 = vld [vmem:[%s396_s3 + $0x40] sm:$0xff] }
   0xa   :  { %175 = vmatmul.msk.f32.vlgmr.msra.gmra.mxu0 %vm50_vm0, %v43_v2  ;;  %96 = vmatpush.msra.mxu1 %v89_v4  ;;  %v82_v11 = vld [vmem:[%s396_s3 + $0x38] sm:$0xff]  ;;  %v81_v12 = vld [vmem:[%s396_s3 + $0x30] sm:$0xff]  ;;  %v80_v13 = vld [vmem:[%s396_s3 + $0x28] sm:$0xff] }
   0xb   :  { %v79_v14 = vld [vmem:[%s396_s3 + $0x20] sm:$0xff]  ;;  %v78_v15 = vld [vmem:[%s396_s3 + $0x18] sm:$0xff]  ;;  %v77_v16 = vld [vmem:[%s396_s3 + $0x10] sm:$0xff] }
   0xc   :  { %97 = vmatpush.msra.mxu1 %v88_v5  ;;  %v76_v17 = vld [vmem:[%s396_s3 + $0x8] sm:$0xff]  ;;  %v75_v18 = vld [vmem:[%s396_s3] sm:$0xff]  ;;  %v131_v19 = vld [vmem:[%s398_s5 + $0x78] sm:$0xff] }
   0xd   :  { %v130_v20 = vld [vmem:[%s398_s5 + $0x70] sm:$0xff]  ;;  %136 = vmatpush.msra.mxu2 %v131_v19  ;;  %v129_v21 = vld [vmem:[%s398_s5 + $0x68] sm:$0xff]  ;;  %v128_v22 = vld [vmem:[%s398_s5 + $0x60] sm:$0xff] }
   0xe   :  { %98 = vmatpush.msra.mxu1 %v87_v6  ;;  %v127_v23 = vld [vmem:[%s398_s5 + $0x58] sm:$0xff]  ;;  %v126_v24 = vld [vmem:[%s398_s5 + $0x50] sm:$0xff]  ;;  %v125_v25 = vld [vmem:[%s398_s5 + $0x48] sm:$0xff] }
   0xf   :  { %137 = vmatpush.msra.mxu2 %v130_v20  ;;  %v124_v26 = vld [vmem:[%s398_s5 + $0x40] sm:$0xff]  ;;  %v123_v27 = vld [vmem:[%s398_s5 + $0x38] sm:$0xff]  ;;  %v122_v28 = vld [vmem:[%s398_s5 + $0x30] sm:$0xff] }
  0x10   :  { %99 = vmatpush.msra.mxu1 %v86_v7  ;;  %v121_v29 = vld [vmem:[%s398_s5 + $0x28] sm:$0xff]  ;;  %v120_v30 = vld [vmem:[%s398_s5 + $0x20] sm:$0xff]  ;;  %v119_v31 = vld [vmem:[%s398_s5 + $0x18] sm:$0xff] }
  0x11   :  { %138 = vmatpush.msra.mxu2 %v129_v21  ;;  %v180_v32 = vld [vmem:[%s395_s2] ss:$0 sm:$0xff]  ;;  %v118_v36 = vld [vmem:[%s398_s5 + $0x10] sm:$0xff]  ;;  %v117_v37 = vld [vmem:[%s398_s5 + $0x8] sm:$0xff] }
  0x12   :  { %100 = vmatpush.msra.mxu1 %v85_v8  ;;  %v116_v38 = vld [vmem:[%s398_s5] sm:$0xff] }
  0x13   :  { %139 = vmatpush.msra.mxu2 %v128_v22  ;;  %v181_v39 = vld [vmem:[%s397_s4] ss:$0 sm:$0xff] }
  0x14   :  { %101 = vmatpush.msra.mxu1 %v84_v9  ;;  %v182_v43 = vld [vmem:[%s399_s6] ss:$0 sm:$0xff] }
  0x15   :  { %140 = vmatpush.msra.mxu2 %v127_v23 }
  0x16   :  { %102 = vmatpush.msra.mxu1 %v83_v10 }
  0x17   :  { %141 = vmatpush.msra.mxu2 %v126_v24 }
  0x18   :  { %103 = vmatpush.msra.mxu1 %v82_v11 }
  0x19   :  { %142 = vmatpush.msra.mxu2 %v125_v25 }
  0x1a   :  { %104 = vmatpush.msra.mxu1 %v81_v12 }
  0x1b   :  { %143 = vmatpush.msra.mxu2 %v124_v26 }
  0x1c   :  { %105 = vmatpush.msra.mxu1 %v80_v13 }
  0x1d   :  { %144 = vmatpush.msra.mxu2 %v123_v27 }
  0x1e   :  { %106 = vmatpush.msra.mxu1 %v79_v14 }
  0x1f   :  { %145 = vmatpush.msra.mxu2 %v122_v28 }
  0x20   :  { %107 = vmatpush.msra.mxu1 %v78_v15 }
  0x21   :  { %146 = vmatpush.msra.mxu2 %v121_v29 }
  0x22   :  { %108 = vmatpush.msra.mxu1 %v77_v16 }
  0x23   :  { %147 = vmatpush.msra.mxu2 %v120_v30 }
  0x24   :  { %109 = vmatpush.msra.mxu1 %v76_v17 }
  0x25   :  { %148 = vmatpush.msra.mxu2 %v119_v31 }
  0x26   :  { %110 = vmatpush.msra.mxu1 %v75_v18 }
  0x27   :  { %149 = vmatpush.msra.mxu2 %v118_v36 }
  0x29   :  { %150 = vmatpush.msra.mxu2 %v117_v37 }
  0x2b   :  { %151 = vmatpush.msra.mxu2 %v116_v38 }
  0x87   :  { %v71_v33 = vpop.f32.mrf.mxu0 }
  0x88   :  { %v72_v34 = vadd.f32 %v180_v32, %v71_v33 }
  0x8a   :  { %v74_v35 = vmax.f32 %v72_v34, 0.0 }
  0x8c   :  { %111 = vmatmul.f32.vlgmr.msra.gmra.mxu1 %v74_v35 }
 0x109   :  { %v112_v40 = vpop.f32.mrf.mxu1 }
 0x10a   :  { %v113_v41 = vadd.f32 %v181_v39, %v112_v40 }
 0x10c   :  { %v115_v42 = vmax.f32 %v113_v41, 0.0 }
 0x10e   :  { %152 = vmatmul.f32.vlgmr.msra.gmra.mxu2 %v115_v42 }
 0x191   :  { %v153_v44 = vpop.f32.mrf.mxu2 }
 0x192   :  { %v154_v45 = vadd.f32 %v182_v43, %v153_v44 }
 0x194   :  { %157 = vst.msk [vmem:[#allocation5] sm:$0xff] %vm156_vm1, %v154_v45 }
 0x195   :  { %168 = dma.vmem_to_hbm [thread:$0]  %s164_s26, 128, %s166_s29, [#allocation4]  }
 0x196   :  { %233 = dma.done.wait [#allocation4], 128  }
 0x197   :  { %234 = vsyncadd [#allocation4], 4294967168 }
 0x198   :  { %173 = vsyncpa [#allocation3], 1 }
 0x199   :  { %174 = vsyncpa [#allocation4], 1 }

</bundles_post_ra>
